<compile_context>
chip_gen: v7x
topology: tpu7x:2x2x1
jax: 0.10.0
libtpu: 0.0.40
codegen_flags: <defaults>
</compile_context>

<pallas_src>
import numpy as np
from string import ascii_lowercase
from types import SimpleNamespace

import jax
import jax.numpy as jnp
from jax.experimental import pallas as pl
from jax.experimental.pallas import tpu as pltpu

NEG = -1.0e30  # finite stand-in for -inf (avoids inf-inf NaNs in logsumexp)


def _round_up(x, m):
    return ((x + m - 1) // m) * m


# ---------------------------------------------------------------------------
# Pallas kernel 1: fused MSE sum + gradient-prior L1 sum (tiled, lane-dense)
# ---------------------------------------------------------------------------
def image_losses(sr, hr):
    """Returns (mse, gp) matching nn.MSELoss()(sr, hr) and
    GradientPriorLoss()(sr[:, :3], hr[:, :3])."""
    B, C, H, W = sr.shape
    R, L = B * C, H * W

    x = sr.reshape(R, L)
    y = hr.reshape(R, L)

    # Row-block size: keep each input block <= ~2 MiB so 2 inputs x 2 pipeline
    # buffers fit comfortably under the default scoped-VMEM limit on every
    # generation (v7x has only 64 MiB of physical VMEM).
    itemsize = jnp.dtype(sr.dtype).itemsize
    rows_cap = max(1, (2 * 1024 * 1024) // (L * itemsize))
    bm = min(512, max(8, (rows_cap // 8) * 8), _round_up(R, 8))
    R_pad = _round_up(R, bm)
    if R_pad != R:
        # Zero pad rows contribute 0 to both sums (identical sr/hr pad rows).
        x = jnp.pad(x, ((0, R_pad - R), (0, 0)))
        y = jnp.pad(y, ((0, R_pad - R), (0, 0)))
    nblocks = R_pad // bm

    # Precomputed edge masks over the flattened (h, w) lane axis:
    #   row 0: right neighbour exists, row 1: left, row 2: top, row 3: bottom.
    w_np = np.arange(L) % W
    h_np = np.arange(L) // W
    masks_np = np.zeros((8, L), np.float32)
    masks_np[0] = (w_np < W - 1)
    masks_np[1] = (w_np > 0)
    masks_np[2] = (h_np > 0)
    masks_np[3] = (h_np < H - 1)

    # Gradient-prior row mask: only the first 3 channels, only real rows.
    rows_np = np.arange(R_pad)
    gpm_np = (((rows_np % C) < 3) & (rows_np < R)).astype(np.float32)[:, None]

    def kernel(sr_ref, hr_ref, msk_ref, gpm_ref, mse_ref, gp_ref):
        # Widen per tile (lets bf16 inputs stay bf16 on the HBM side).
        sr_t = sr_ref[...].astype(jnp.float32)
        hr_t = hr_ref[...].astype(jnp.float32)

        d = sr_t - hr_t
        mse_part = jnp.sum(d * d)

        msk = msk_ref[...]
        m_r, m_l, m_t, m_b = msk[0:1], msk[1:2], msk[2:3], msk[3:4]

        def gradient_map(v):
            # Shifted neighbours via XLU rolls + edge masks (zero beyond the
            # border), replicating GradientPriorLoss.gradient_map exactly.
            r = pltpu.roll(v, shift=L - 1, axis=1) * m_r   # x[.., w+1]
            l = pltpu.roll(v, shift=1, axis=1) * m_l       # x[.., w-1]
            t = pltpu.roll(v, shift=W, axis=1) * m_t       # x[.., h-1]
            b = pltpu.roll(v, shift=L - W, axis=1) * m_b   # x[.., h+1]
            return jnp.sqrt(((r - l) * 0.5) ** 2 + ((t - b) * 0.5) ** 2 + 1e-6)

        gp_part = jnp.sum(
            jnp.abs(gradient_map(sr_t) - gradient_map(hr_t)) * gpm_ref[...])

        # One small splat per block; cross-block reduce happens once in the
        # wrapper (keeps the grid axis fully parallel).
        mse_ref[...] = jnp.broadcast_to(mse_part, (1, 8, 128))
        gp_ref[...] = jnp.broadcast_to(gp_part, (1, 8, 128))

    mse_parts, gp_parts = pl.pallas_call(
        kernel,
        out_shape=(jax.ShapeDtypeStruct((nblocks, 8, 128), jnp.float32),
                   jax.ShapeDtypeStruct((nblocks, 8, 128), jnp.float32)),
        grid_spec=pltpu.PrefetchScalarGridSpec(
            num_scalar_prefetch=0,
            grid=(nblocks,),
            in_specs=[pl.BlockSpec((bm, L), lambda i: (i, 0)),
                      pl.BlockSpec((bm, L), lambda i: (i, 0)),
                      pl.BlockSpec((8, L), lambda i: (0, 0)),
                      pl.BlockSpec((bm, 1), lambda i: (i, 0))],
            out_specs=(pl.BlockSpec((1, 8, 128), lambda i: (i, 0, 0)),
                       pl.BlockSpec((1, 8, 128), lambda i: (i, 0, 0)))),
        compiler_params=pltpu.CompilerParams(
            dimension_semantics=("parallel",)),
    )(x, y, jnp.asarray(masks_np), jnp.asarray(gpm_np))

    mse = jnp.sum(mse_parts[:, 0, 0]) / (B * C * H * W)   # nn.MSELoss(mean)
    gp = jnp.sum(gp_parts[:, 0, 0]) / (B * 3 * H * W)     # nn.L1Loss(mean)
    return mse, gp


# ---------------------------------------------------------------------------
# Pallas kernel 2: CTC forward DP (log-alpha recursion, alpha in registers)
# ---------------------------------------------------------------------------
def _ctc_alpha_kernel(lp_ref, skip_ref, fin_ref, nll_ref):
    # lp_ref:   (T, N, Spad) log p of extended-label symbol s at time t
    #           (padded s positions hold NEG)
    # skip_ref: (N, Spad)  0 where skip-by-2 transition allowed, NEG otherwise
    # fin_ref:  (N, Spad)  0 at the two admissible final positions, NEG else
    # nll_ref:  (N, 1)     per-sample negative log likelihood (output)
    T, N, Spad = lp_ref.shape

    s_idx = jax.lax.broadcasted_iota(jnp.int32, (N, Spad), 1)
    ge1 = s_idx >= 1
    ge2 = s_idx >= 2
    # Hoist time-invariant loads out of the serial recurrence.
    skip = skip_ref[...]
    fin = fin_ref[...]

    alpha = jnp.where(s_idx < 2, lp_ref[0], NEG)

    def step(t, alpha):
        lp_t = lp_ref[t]
        a1 = jnp.where(ge1, pltpu.roll(alpha, shift=1, axis=1), NEG)
        a2 = jnp.where(ge2, pltpu.roll(alpha, shift=2, axis=1), NEG) + skip
        m = jnp.maximum(jnp.maximum(alpha, a1), a2)
        lse = m + jnp.log(jnp.exp(alpha - m) + jnp.exp(a1 - m) + jnp.exp(a2 - m))
        return lse + lp_t

    if T <= 64:
        # Fully unrolled time loop; alpha stays in vregs (no VMEM round trips).
        for t in range(1, T):
            alpha = step(t, alpha)
    else:
        alpha = jax.lax.fori_loop(1, T, step, alpha)

    af = alpha + fin
    m = jnp.max(af, axis=1, keepdims=True)
    lse = m + jnp.log(jnp.sum(jnp.exp(af - m), axis=1, keepdims=True))
    nll_ref[...] = -lse


def ctc_loss_fn(log_probs, targets, target_lengths):
    """Reproduces nn.CTCLoss(blank=0, reduction='mean', zero_infinity=True)."""
    T, N, C = log_probs.shape
    S = targets.shape[1]
    Sext = 2 * S + 1
    Spad = max(128, _round_up(Sext, 128))   # lane-pad the extended-label axis

    tnp = np.asarray(targets, np.int32)
    tl = np.asarray(target_lengths, np.int32)

    # Extended label: blank, t0, blank, t1, ..., blank (pad positions -> 0).
    ext = np.zeros((N, Spad), np.int32)
    ext[:, 1:Sext:2] = tnp

    # Gather lp_ext[t, n, s] = log_probs[t, n, ext[n, s]] on device.
    # TODO(synk): fuse this gather into the Pallas kernel (scalar-prefetched
    # ext table / one-hot matmul) to drop the extra lp_ext HBM round trip.
    ext_j = jnp.asarray(ext)
    lp_ext = jnp.take_along_axis(
        log_probs.astype(jnp.float32),
        jnp.broadcast_to(ext_j[None, :, :], (T, N, Spad)), axis=2)
    s_valid = jnp.arange(Spad) < Sext
    lp_ext = jnp.where(s_valid[None, None, :], lp_ext, NEG)

    # Skip-by-2 allowed only at non-blank positions whose label differs from
    # the previous non-blank label (vectorized, no Python double loop).
    skip = np.full((N, Spad), NEG, np.float32)
    if S > 1:
        neq = tnp[:, 1:] != tnp[:, :-1]              # (N, S-1)
        cols = 2 * np.arange(1, S) + 1               # 3, 5, ..., 2S-1
        skip[:, cols] = np.where(neq, 0.0, NEG)

    # Admissible final positions: last label and trailing blank.
    fin = np.full((N, Spad), NEG, np.float32)
    rows = np.arange(N)
    fin[rows, 2 * tl] = 0.0
    has = tl > 0
    fin[rows[has], 2 * tl[has] - 1] = 0.0

    nll = pl.pallas_call(
        _ctc_alpha_kernel,
        out_shape=jax.ShapeDtypeStruct((N, 1), jnp.float32),
        in_specs=[pl.BlockSpec(memory_space=pltpu.MemorySpace.VMEM)] * 3,
        out_specs=pl.BlockSpec(memory_space=pltpu.MemorySpace.VMEM),
    )(lp_ext, jnp.asarray(skip), jnp.asarray(fin))

    per_sample = nll[:, 0]
    # zero_infinity=True: impossible alignments show up as ~|NEG|-sized losses
    # with the finite sentinel; zero them like torch zeroes inf.
    per_sample = jnp.where(per_sample > 1e29, 0.0, per_sample)
    # reduction='mean': divide by target lengths, then mean over the batch.
    return jnp.mean(per_sample / jnp.maximum(jnp.asarray(tl, jnp.float32), 1.0))


# ---------------------------------------------------------------------------
# Vocab + label processing (deterministic synthetic stand-in for util.get_vocab)
# ---------------------------------------------------------------------------
def get_vocab():
    letters = {c: 11 + i for i, c in enumerate(ascii_lowercase)}   # a..z -> 11..36
    symbols = {}
    full_list = (['BLANK'] + [str(d) for d in range(1, 10)] + ['0']
                 + list(ascii_lowercase) + ['PAD'])
    full = {ch: i for i, ch in enumerate(full_list)}               # PAD = 37
    return letters, symbols, full, full_list


def build_targets(labels, weight, letters, symbols, pad_idx):
    bs = len(labels)
    targets = np.full((bs, weight), pad_idx, np.int32)
    target_lengths = np.zeros((bs,), np.int32)
    for count, label in enumerate(labels):
        tgt = []
        for ch in label:
            if ch.isdigit():
                tgt.append(10 if int(ch) == 0 else int(ch))
            elif ch in letters:
                tgt.append(int(letters[ch]))
            elif ch in symbols:
                tgt.append(int(symbols[ch]))
        targets[count, :len(tgt)] = np.array(tgt, np.int32)
        # NOTE: matches the torch module (target_lengths = len(label)); labels
        # with unmappable characters would desync lengths there too.
        target_lengths[count] = len(label)
    return targets, target_lengths


# ---------------------------------------------------------------------------
# WangjiLoss.forward
# ---------------------------------------------------------------------------
def wangji_loss_forward(sr_img, tag_scores, hr_img, labels, cfg, vocab):
    letters, symbols, full_vocab, _ = vocab
    weight = int(cfg.width / cfg.scale_factor / 2)

    ctc = jnp.float32(0.0)
    if cfg.enable_rec:
        targets, target_lengths = build_targets(
            labels, weight, letters, symbols, int(full_vocab['PAD']))
        ctc = ctc_loss_fn(tag_scores, targets, target_lengths)

    mse = jnp.float32(0.0)
    gp = jnp.float32(0.0)
    if cfg.enable_sr or cfg.gradient_loss:
        mse_k, gp_k = image_losses(sr_img, hr_img)
        if cfg.enable_sr:
            mse = mse_k
        if cfg.gradient_loss:
            gp = gp_k

    loss = mse * cfg.lambda_mse + ctc * cfg.lambda_ctc + gp * cfg.lambda_gradient
    return loss, mse, ctc, gp


if __name__ == "__main__":
    cfg = SimpleNamespace(
        width=64, scale_factor=2,
        enable_rec=True, enable_sr=True, gradient_loss=True,
        lambda_mse=1.0, lambda_ctc=0.5, lambda_gradient=0.1,
    )
    vocab = get_vocab()
    num_classes = 38                     # BLANK + 1..9 + '0' + a..z + PAD
    weight = int(cfg.width / cfg.scale_factor / 2)   # 16 time steps

    B, Cimg, H, W = 2, 4, 16, 16
    key = jax.random.PRNGKey(0)
    k1, k2, k3 = jax.random.split(key, 3)
    sr_img = jax.random.uniform(k1, (B, Cimg, H, W), jnp.float32)
    hr_img = jax.random.uniform(k2, (B, Cimg, H, W), jnp.float32)
    logits = jax.random.normal(k3, (weight, B, num_classes), jnp.float32)
    tag_scores = jax.nn.log_softmax(logits, axis=-1)  # CTCLoss expects log-probs
    labels = ["hello", "2024ab"]

    loss, mse, ctc, gp = wangji_loss_forward(
        sr_img, tag_scores, hr_img, labels, cfg, vocab)
    jax.block_until_ready((loss, mse, ctc, gp))
    print("KERNEL_OK")
</pallas_src>

<mosaic_0001>
module attributes {stable_mosaic.version = 11 : i64} {
  func.func @_ctc_alpha_kernel(%arg0: memref<16x2x128xf32, #tpu.memory_space<vmem>>, %arg1: memref<2x128xf32, #tpu.memory_space<vmem>>, %arg2: memref<2x128xf32, #tpu.memory_space<vmem>>, %arg3: memref<2x1xf32, #tpu.memory_space<vmem>>) attributes {dimension_semantics = [], scalar_prefetch = 0 : i64, scratch_operands = 0 : i64, tpu.core_type = #tpu.core_type<tc>} {
    %0 = tpu.iota {dimensions = array<i32: 1>} : vector<2x128xi32>
    %c1_i32 = arith.constant 1 : i32
    %1 = vector.broadcast %c1_i32 : i32 to vector<2x128xi32>
    %2 = arith.cmpi sge, %0, %1 : vector<2x128xi32>
    %c2_i32 = arith.constant 2 : i32
    %3 = vector.broadcast %c2_i32 : i32 to vector<2x128xi32>
    %4 = arith.cmpi sge, %0, %3 : vector<2x128xi32>
    %c0 = arith.constant 0 : index
    %c0_0 = arith.constant 0 : index
    %5 = vector.load %arg1[%c0, %c0_0] : memref<2x128xf32, #tpu.memory_space<vmem>>, vector<2x128xf32>
    %c0_1 = arith.constant 0 : index
    %c0_2 = arith.constant 0 : index
    %6 = vector.load %arg2[%c0_1, %c0_2] : memref<2x128xf32, #tpu.memory_space<vmem>>, vector<2x128xf32>
    %c2_i32_3 = arith.constant 2 : i32
    %7 = vector.broadcast %c2_i32_3 : i32 to vector<2x128xi32>
    %8 = arith.cmpi slt, %0, %7 : vector<2x128xi32>
    %c0_4 = arith.constant 0 : index
    %c0_5 = arith.constant 0 : index
    %c0_6 = arith.constant 0 : index
    %9 = vector.load %arg0[%c0_4, %c0_5, %c0_6] : memref<16x2x128xf32, #tpu.memory_space<vmem>>, vector<1x2x128xf32>
    %10 = vector.shape_cast %9 : vector<1x2x128xf32> to vector<2x128xf32>
    %cst = arith.constant -1.000000e+30 : f32
    %11 = vector.broadcast %cst : f32 to vector<2x128xf32>
    %12 = arith.select %8, %10, %11 : vector<2x128xi1>, vector<2x128xf32>
    %c1 = arith.constant 1 : index
    %c0_7 = arith.constant 0 : index
    %c0_8 = arith.constant 0 : index
    %13 = vector.load %arg0[%c1, %c0_7, %c0_8] : memref<16x2x128xf32, #tpu.memory_space<vmem>>, vector<1x2x128xf32>
    %14 = vector.shape_cast %13 : vector<1x2x128xf32> to vector<2x128xf32>
    %c1_i32_9 = arith.constant 1 : i32
    %15 = tpu.dynamic_rotate %12 by %c1_i32_9 dim 1 : vector<2x128xf32>, i32 -> vector<2x128xf32>
    %cst_10 = arith.constant -1.000000e+30 : f32
    %16 = vector.broadcast %cst_10 : f32 to vector<2x128xf32>
    %17 = arith.select %2, %15, %16 : vector<2x128xi1>, vector<2x128xf32>
    %c2_i32_11 = arith.constant 2 : i32
    %18 = tpu.dynamic_rotate %12 by %c2_i32_11 dim 1 : vector<2x128xf32>, i32 -> vector<2x128xf32>
    %cst_12 = arith.constant -1.000000e+30 : f32
    %19 = vector.broadcast %cst_12 : f32 to vector<2x128xf32>
    %20 = arith.select %4, %18, %19 : vector<2x128xi1>, vector<2x128xf32>
    %21 = arith.addf %20, %5 : vector<2x128xf32>
    %22 = arith.maximumf %12, %17 : vector<2x128xf32>
    %23 = arith.maximumf %22, %21 : vector<2x128xf32>
    %24 = arith.subf %12, %23 : vector<2x128xf32>
    %25 = math.exp %24 : vector<2x128xf32>
    %26 = arith.subf %17, %23 : vector<2x128xf32>
    %27 = math.exp %26 : vector<2x128xf32>
    %28 = arith.addf %25, %27 : vector<2x128xf32>
    %29 = arith.subf %21, %23 : vector<2x128xf32>
    %30 = math.exp %29 : vector<2x128xf32>
    %31 = arith.addf %28, %30 : vector<2x128xf32>
    %32 = math.log %31 : vector<2x128xf32>
    %33 = arith.addf %23, %32 : vector<2x128xf32>
    %34 = arith.addf %33, %14 : vector<2x128xf32>
    %c2 = arith.constant 2 : index
    %c0_13 = arith.constant 0 : index
    %c0_14 = arith.constant 0 : index
    %35 = vector.load %arg0[%c2, %c0_13, %c0_14] : memref<16x2x128xf32, #tpu.memory_space<vmem>>, vector<1x2x128xf32>
    %36 = vector.shape_cast %35 : vector<1x2x128xf32> to vector<2x128xf32>
    %c1_i32_15 = arith.constant 1 : i32
    %37 = tpu.dynamic_rotate %34 by %c1_i32_15 dim 1 : vector<2x128xf32>, i32 -> vector<2x128xf32>
    %cst_16 = arith.constant -1.000000e+30 : f32
    %38 = vector.broadcast %cst_16 : f32 to vector<2x128xf32>
    %39 = arith.select %2, %37, %38 : vector<2x128xi1>, vector<2x128xf32>
    %c2_i32_17 = arith.constant 2 : i32
    %40 = tpu.dynamic_rotate %34 by %c2_i32_17 dim 1 : vector<2x128xf32>, i32 -> vector<2x128xf32>
    %cst_18 = arith.constant -1.000000e+30 : f32
    %41 = vector.broadcast %cst_18 : f32 to vector<2x128xf32>
    %42 = arith.select %4, %40, %41 : vector<2x128xi1>, vector<2x128xf32>
    %43 = arith.addf %42, %5 : vector<2x128xf32>
    %44 = arith.maximumf %34, %39 : vector<2x128xf32>
    %45 = arith.maximumf %44, %43 : vector<2x128xf32>
    %46 = arith.subf %34, %45 : vector<2x128xf32>
    %47 = math.exp %46 : vector<2x128xf32>
    %48 = arith.subf %39, %45 : vector<2x128xf32>
    %49 = math.exp %48 : vector<2x128xf32>
    %50 = arith.addf %47, %49 : vector<2x128xf32>
    %51 = arith.subf %43, %45 : vector<2x128xf32>
    %52 = math.exp %51 : vector<2x128xf32>
    %53 = arith.addf %50, %52 : vector<2x128xf32>
    %54 = math.log %53 : vector<2x128xf32>
    %55 = arith.addf %45, %54 : vector<2x128xf32>
    %56 = arith.addf %55, %36 : vector<2x128xf32>
    %c3 = arith.constant 3 : index
    %c0_19 = arith.constant 0 : index
    %c0_20 = arith.constant 0 : index
    %57 = vector.load %arg0[%c3, %c0_19, %c0_20] : memref<16x2x128xf32, #tpu.memory_space<vmem>>, vector<1x2x128xf32>
    %58 = vector.shape_cast %57 : vector<1x2x128xf32> to vector<2x128xf32>
    %c1_i32_21 = arith.constant 1 : i32
    %59 = tpu.dynamic_rotate %56 by %c1_i32_21 dim 1 : vector<2x128xf32>, i32 -> vector<2x128xf32>
    %cst_22 = arith.constant -1.000000e+30 : f32
    %60 = vector.broadcast %cst_22 : f32 to vector<2x128xf32>
    %61 = arith.select %2, %59, %60 : vector<2x128xi1>, vector<2x128xf32>
    %c2_i32_23 = arith.constant 2 : i32
    %62 = tpu.dynamic_rotate %56 by %c2_i32_23 dim 1 : vector<2x128xf32>, i32 -> vector<2x128xf32>
    %cst_24 = arith.constant -1.000000e+30 : f32
    %63 = vector.broadcast %cst_24 : f32 to vector<2x128xf32>
    %64 = arith.select %4, %62, %63 : vector<2x128xi1>, vector<2x128xf32>
    %65 = arith.addf %64, %5 : vector<2x128xf32>
    %66 = arith.maximumf %56, %61 : vector<2x128xf32>
    %67 = arith.maximumf %66, %65 : vector<2x128xf32>
    %68 = arith.subf %56, %67 : vector<2x128xf32>
    %69 = math.exp %68 : vector<2x128xf32>
    %70 = arith.subf %61, %67 : vector<2x128xf32>
    %71 = math.exp %70 : vector<2x128xf32>
    %72 = arith.addf %69, %71 : vector<2x128xf32>
    %73 = arith.subf %65, %67 : vector<2x128xf32>
    %74 = math.exp %73 : vector<2x128xf32>
    %75 = arith.addf %72, %74 : vector<2x128xf32>
    %76 = math.log %75 : vector<2x128xf32>
    %77 = arith.addf %67, %76 : vector<2x128xf32>
    %78 = arith.addf %77, %58 : vector<2x128xf32>
    %c4 = arith.constant 4 : index
    %c0_25 = arith.constant 0 : index
    %c0_26 = arith.constant 0 : index
    %79 = vector.load %arg0[%c4, %c0_25, %c0_26] : memref<16x2x128xf32, #tpu.memory_space<vmem>>, vector<1x2x128xf32>
    %80 = vector.shape_cast %79 : vector<1x2x128xf32> to vector<2x128xf32>
    %c1_i32_27 = arith.constant 1 : i32
    %81 = tpu.dynamic_rotate %78 by %c1_i32_27 dim 1 : vector<2x128xf32>, i32 -> vector<2x128xf32>
    %cst_28 = arith.constant -1.000000e+30 : f32
    %82 = vector.broadcast %cst_28 : f32 to vector<2x128xf32>
    %83 = arith.select %2, %81, %82 : vector<2x128xi1>, vector<2x128xf32>
    %c2_i32_29 = arith.constant 2 : i32
    %84 = tpu.dynamic_rotate %78 by %c2_i32_29 dim 1 : vector<2x128xf32>, i32 -> vector<2x128xf32>
    %cst_30 = arith.constant -1.000000e+30 : f32
    %85 = vector.broadcast %cst_30 : f32 to vector<2x128xf32>
    %86 = arith.select %4, %84, %85 : vector<2x128xi1>, vector<2x128xf32>
    %87 = arith.addf %86, %5 : vector<2x128xf32>
    %88 = arith.maximumf %78, %83 : vector<2x128xf32>
    %89 = arith.maximumf %88, %87 : vector<2x128xf32>
    %90 = arith.subf %78, %89 : vector<2x128xf32>
    %91 = math.exp %90 : vector<2x128xf32>
    %92 = arith.subf %83, %89 : vector<2x128xf32>
    %93 = math.exp %92 : vector<2x128xf32>
    %94 = arith.addf %91, %93 : vector<2x128xf32>
    %95 = arith.subf %87, %89 : vector<2x128xf32>
    %96 = math.exp %95 : vector<2x128xf32>
    %97 = arith.addf %94, %96 : vector<2x128xf32>
    %98 = math.log %97 : vector<2x128xf32>
    %99 = arith.addf %89, %98 : vector<2x128xf32>
    %100 = arith.addf %99, %80 : vector<2x128xf32>
    %c5 = arith.constant 5 : index
    %c0_31 = arith.constant 0 : index
    %c0_32 = arith.constant 0 : index
    %101 = vector.load %arg0[%c5, %c0_31, %c0_32] : memref<16x2x128xf32, #tpu.memory_space<vmem>>, vector<1x2x128xf32>
    %102 = vector.shape_cast %101 : vector<1x2x128xf32> to vector<2x128xf32>
    %c1_i32_33 = arith.constant 1 : i32
    %103 = tpu.dynamic_rotate %100 by %c1_i32_33 dim 1 : vector<2x128xf32>, i32 -> vector<2x128xf32>
    %cst_34 = arith.constant -1.000000e+30 : f32
    %104 = vector.broadcast %cst_34 : f32 to vector<2x128xf32>
    %105 = arith.select %2, %103, %104 : vector<2x128xi1>, vector<2x128xf32>
    %c2_i32_35 = arith.constant 2 : i32
    %106 = tpu.dynamic_rotate %100 by %c2_i32_35 dim 1 : vector<2x128xf32>, i32 -> vector<2x128xf32>
    %cst_36 = arith.constant -1.000000e+30 : f32
    %107 = vector.broadcast %cst_36 : f32 to vector<2x128xf32>
    %108 = arith.select %4, %106, %107 : vector<2x128xi1>, vector<2x128xf32>
    %109 = arith.addf %108, %5 : vector<2x128xf32>
    %110 = arith.maximumf %100, %105 : vector<2x128xf32>
    %111 = arith.maximumf %110, %109 : vector<2x128xf32>
    %112 = arith.subf %100, %111 : vector<2x128xf32>
    %113 = math.exp %112 : vector<2x128xf32>
    %114 = arith.subf %105, %111 : vector<2x128xf32>
    %115 = math.exp %114 : vector<2x128xf32>
    %116 = arith.addf %113, %115 : vector<2x128xf32>
    %117 = arith.subf %109, %111 : vector<2x128xf32>
    %118 = math.exp %117 : vector<2x128xf32>
    %119 = arith.addf %116, %118 : vector<2x128xf32>
    %120 = math.log %119 : vector<2x128xf32>
    %121 = arith.addf %111, %120 : vector<2x128xf32>
    %122 = arith.addf %121, %102 : vector<2x128xf32>
    %c6 = arith.constant 6 : index
    %c0_37 = arith.constant 0 : index
    %c0_38 = arith.constant 0 : index
    %123 = vector.load %arg0[%c6, %c0_37, %c0_38] : memref<16x2x128xf32, #tpu.memory_space<vmem>>, vector<1x2x128xf32>
    %124 = vector.shape_cast %123 : vector<1x2x128xf32> to vector<2x128xf32>
    %c1_i32_39 = arith.constant 1 : i32
    %125 = tpu.dynamic_rotate %122 by %c1_i32_39 dim 1 : vector<2x128xf32>, i32 -> vector<2x128xf32>
    %cst_40 = arith.constant -1.000000e+30 : f32
    %126 = vector.broadcast %cst_40 : f32 to vector<2x128xf32>
    %127 = arith.select %2, %125, %126 : vector<2x128xi1>, vector<2x128xf32>
    %c2_i32_41 = arith.constant 2 : i32
    %128 = tpu.dynamic_rotate %122 by %c2_i32_41 dim 1 : vector<2x128xf32>, i32 -> vector<2x128xf32>
    %cst_42 = arith.constant -1.000000e+30 : f32
    %129 = vector.broadcast %cst_42 : f32 to vector<2x128xf32>
    %130 = arith.select %4, %128, %129 : vector<2x128xi1>, vector<2x128xf32>
    %131 = arith.addf %130, %5 : vector<2x128xf32>
    %132 = arith.maximumf %122, %127 : vector<2x128xf32>
    %133 = arith.maximumf %132, %131 : vector<2x128xf32>
    %134 = arith.subf %122, %133 : vector<2x128xf32>
    %135 = math.exp %134 : vector<2x128xf32>
    %136 = arith.subf %127, %133 : vector<2x128xf32>
    %137 = math.exp %136 : vector<2x128xf32>
    %138 = arith.addf %135, %137 : vector<2x128xf32>
    %139 = arith.subf %131, %133 : vector<2x128xf32>
    %140 = math.exp %139 : vector<2x128xf32>
    %141 = arith.addf %138, %140 : vector<2x128xf32>
    %142 = math.log %141 : vector<2x128xf32>
    %143 = arith.addf %133, %142 : vector<2x128xf32>
    %144 = arith.addf %143, %124 : vector<2x128xf32>
    %c7 = arith.constant 7 : index
    %c0_43 = arith.constant 0 : index
    %c0_44 = arith.constant 0 : index
    %145 = vector.load %arg0[%c7, %c0_43, %c0_44] : memref<16x2x128xf32, #tpu.memory_space<vmem>>, vector<1x2x128xf32>
    %146 = vector.shape_cast %145 : vector<1x2x128xf32> to vector<2x128xf32>
    %c1_i32_45 = arith.constant 1 : i32
    %147 = tpu.dynamic_rotate %144 by %c1_i32_45 dim 1 : vector<2x128xf32>, i32 -> vector<2x128xf32>
    %cst_46 = arith.constant -1.000000e+30 : f32
    %148 = vector.broadcast %cst_46 : f32 to vector<2x128xf32>
    %149 = arith.select %2, %147, %148 : vector<2x128xi1>, vector<2x128xf32>
    %c2_i32_47 = arith.constant 2 : i32
    %150 = tpu.dynamic_rotate %144 by %c2_i32_47 dim 1 : vector<2x128xf32>, i32 -> vector<2x128xf32>
    %cst_48 = arith.constant -1.000000e+30 : f32
    %151 = vector.broadcast %cst_48 : f32 to vector<2x128xf32>
    %152 = arith.select %4, %150, %151 : vector<2x128xi1>, vector<2x128xf32>
    %153 = arith.addf %152, %5 : vector<2x128xf32>
    %154 = arith.maximumf %144, %149 : vector<2x128xf32>
    %155 = arith.maximumf %154, %153 : vector<2x128xf32>
    %156 = arith.subf %144, %155 : vector<2x128xf32>
    %157 = math.exp %156 : vector<2x128xf32>
    %158 = arith.subf %149, %155 : vector<2x128xf32>
    %159 = math.exp %158 : vector<2x128xf32>
    %160 = arith.addf %157, %159 : vector<2x128xf32>
    %161 = arith.subf %153, %155 : vector<2x128xf32>
    %162 = math.exp %161 : vector<2x128xf32>
    %163 = arith.addf %160, %162 : vector<2x128xf32>
    %164 = math.log %163 : vector<2x128xf32>
    %165 = arith.addf %155, %164 : vector<2x128xf32>
    %166 = arith.addf %165, %146 : vector<2x128xf32>
    %c8 = arith.constant 8 : index
    %c0_49 = arith.constant 0 : index
    %c0_50 = arith.constant 0 : index
    %167 = vector.load %arg0[%c8, %c0_49, %c0_50] : memref<16x2x128xf32, #tpu.memory_space<vmem>>, vector<1x2x128xf32>
    %168 = vector.shape_cast %167 : vector<1x2x128xf32> to vector<2x128xf32>
    %c1_i32_51 = arith.constant 1 : i32
    %169 = tpu.dynamic_rotate %166 by %c1_i32_51 dim 1 : vector<2x128xf32>, i32 -> vector<2x128xf32>
    %cst_52 = arith.constant -1.000000e+30 : f32
    %170 = vector.broadcast %cst_52 : f32 to vector<2x128xf32>
    %171 = arith.select %2, %169, %170 : vector<2x128xi1>, vector<2x128xf32>
    %c2_i32_53 = arith.constant 2 : i32
    %172 = tpu.dynamic_rotate %166 by %c2_i32_53 dim 1 : vector<2x128xf32>, i32 -> vector<2x128xf32>
    %cst_54 = arith.constant -1.000000e+30 : f32
    %173 = vector.broadcast %cst_54 : f32 to vector<2x128xf32>
    %174 = arith.select %4, %172, %173 : vector<2x128xi1>, vector<2x128xf32>
    %175 = arith.addf %174, %5 : vector<2x128xf32>
    %176 = arith.maximumf %166, %171 : vector<2x128xf32>
    %177 = arith.maximumf %176, %175 : vector<2x128xf32>
    %178 = arith.subf %166, %177 : vector<2x128xf32>
    %179 = math.exp %178 : vector<2x128xf32>
    %180 = arith.subf %171, %177 : vector<2x128xf32>
    %181 = math.exp %180 : vector<2x128xf32>
    %182 = arith.addf %179, %181 : vector<2x128xf32>
    %183 = arith.subf %175, %177 : vector<2x128xf32>
    %184 = math.exp %183 : vector<2x128xf32>
    %185 = arith.addf %182, %184 : vector<2x128xf32>
    %186 = math.log %185 : vector<2x128xf32>
    %187 = arith.addf %177, %186 : vector<2x128xf32>
    %188 = arith.addf %187, %168 : vector<2x128xf32>
    %c9 = arith.constant 9 : index
    %c0_55 = arith.constant 0 : index
    %c0_56 = arith.constant 0 : index
    %189 = vector.load %arg0[%c9, %c0_55, %c0_56] : memref<16x2x128xf32, #tpu.memory_space<vmem>>, vector<1x2x128xf32>
    %190 = vector.shape_cast %189 : vector<1x2x128xf32> to vector<2x128xf32>
    %c1_i32_57 = arith.constant 1 : i32
    %191 = tpu.dynamic_rotate %188 by %c1_i32_57 dim 1 : vector<2x128xf32>, i32 -> vector<2x128xf32>
    %cst_58 = arith.constant -1.000000e+30 : f32
    %192 = vector.broadcast %cst_58 : f32 to vector<2x128xf32>
    %193 = arith.select %2, %191, %192 : vector<2x128xi1>, vector<2x128xf32>
    %c2_i32_59 = arith.constant 2 : i32
    %194 = tpu.dynamic_rotate %188 by %c2_i32_59 dim 1 : vector<2x128xf32>, i32 -> vector<2x128xf32>
    %cst_60 = arith.constant -1.000000e+30 : f32
    %195 = vector.broadcast %cst_60 : f32 to vector<2x128xf32>
    %196 = arith.select %4, %194, %195 : vector<2x128xi1>, vector<2x128xf32>
    %197 = arith.addf %196, %5 : vector<2x128xf32>
    %198 = arith.maximumf %188, %193 : vector<2x128xf32>
    %199 = arith.maximumf %198, %197 : vector<2x128xf32>
    %200 = arith.subf %188, %199 : vector<2x128xf32>
    %201 = math.exp %200 : vector<2x128xf32>
    %202 = arith.subf %193, %199 : vector<2x128xf32>
    %203 = math.exp %202 : vector<2x128xf32>
    %204 = arith.addf %201, %203 : vector<2x128xf32>
    %205 = arith.subf %197, %199 : vector<2x128xf32>
    %206 = math.exp %205 : vector<2x128xf32>
    %207 = arith.addf %204, %206 : vector<2x128xf32>
    %208 = math.log %207 : vector<2x128xf32>
    %209 = arith.addf %199, %208 : vector<2x128xf32>
    %210 = arith.addf %209, %190 : vector<2x128xf32>
    %c10 = arith.constant 10 : index
    %c0_61 = arith.constant 0 : index
    %c0_62 = arith.constant 0 : index
    %211 = vector.load %arg0[%c10, %c0_61, %c0_62] : memref<16x2x128xf32, #tpu.memory_space<vmem>>, vector<1x2x128xf32>
    %212 = vector.shape_cast %211 : vector<1x2x128xf32> to vector<2x128xf32>
    %c1_i32_63 = arith.constant 1 : i32
    %213 = tpu.dynamic_rotate %210 by %c1_i32_63 dim 1 : vector<2x128xf32>, i32 -> vector<2x128xf32>
    %cst_64 = arith.constant -1.000000e+30 : f32
    %214 = vector.broadcast %cst_64 : f32 to vector<2x128xf32>
    %215 = arith.select %2, %213, %214 : vector<2x128xi1>, vector<2x128xf32>
    %c2_i32_65 = arith.constant 2 : i32
    %216 = tpu.dynamic_rotate %210 by %c2_i32_65 dim 1 : vector<2x128xf32>, i32 -> vector<2x128xf32>
    %cst_66 = arith.constant -1.000000e+30 : f32
    %217 = vector.broadcast %cst_66 : f32 to vector<2x128xf32>
    %218 = arith.select %4, %216, %217 : vector<2x128xi1>, vector<2x128xf32>
    %219 = arith.addf %218, %5 : vector<2x128xf32>
    %220 = arith.maximumf %210, %215 : vector<2x128xf32>
    %221 = arith.maximumf %220, %219 : vector<2x128xf32>
    %222 = arith.subf %210, %221 : vector<2x128xf32>
    %223 = math.exp %222 : vector<2x128xf32>
    %224 = arith.subf %215, %221 : vector<2x128xf32>
    %225 = math.exp %224 : vector<2x128xf32>
    %226 = arith.addf %223, %225 : vector<2x128xf32>
    %227 = arith.subf %219, %221 : vector<2x128xf32>
    %228 = math.exp %227 : vector<2x128xf32>
    %229 = arith.addf %226, %228 : vector<2x128xf32>
    %230 = math.log %229 : vector<2x128xf32>
    %231 = arith.addf %221, %230 : vector<2x128xf32>
    %232 = arith.addf %231, %212 : vector<2x128xf32>
    %c11 = arith.constant 11 : index
    %c0_67 = arith.constant 0 : index
    %c0_68 = arith.constant 0 : index
    %233 = vector.load %arg0[%c11, %c0_67, %c0_68] : memref<16x2x128xf32, #tpu.memory_space<vmem>>, vector<1x2x128xf32>
    %234 = vector.shape_cast %233 : vector<1x2x128xf32> to vector<2x128xf32>
    %c1_i32_69 = arith.constant 1 : i32
    %235 = tpu.dynamic_rotate %232 by %c1_i32_69 dim 1 : vector<2x128xf32>, i32 -> vector<2x128xf32>
    %cst_70 = arith.constant -1.000000e+30 : f32
    %236 = vector.broadcast %cst_70 : f32 to vector<2x128xf32>
    %237 = arith.select %2, %235, %236 : vector<2x128xi1>, vector<2x128xf32>
    %c2_i32_71 = arith.constant 2 : i32
    %238 = tpu.dynamic_rotate %232 by %c2_i32_71 dim 1 : vector<2x128xf32>, i32 -> vector<2x128xf32>
    %cst_72 = arith.constant -1.000000e+30 : f32
    %239 = vector.broadcast %cst_72 : f32 to vector<2x128xf32>
    %240 = arith.select %4, %238, %239 : vector<2x128xi1>, vector<2x128xf32>
    %241 = arith.addf %240, %5 : vector<2x128xf32>
    %242 = arith.maximumf %232, %237 : vector<2x128xf32>
    %243 = arith.maximumf %242, %241 : vector<2x128xf32>
    %244 = arith.subf %232, %243 : vector<2x128xf32>
    %245 = math.exp %244 : vector<2x128xf32>
    %246 = arith.subf %237, %243 : vector<2x128xf32>
    %247 = math.exp %246 : vector<2x128xf32>
    %248 = arith.addf %245, %247 : vector<2x128xf32>
    %249 = arith.subf %241, %243 : vector<2x128xf32>
    %250 = math.exp %249 : vector<2x128xf32>
    %251 = arith.addf %248, %250 : vector<2x128xf32>
    %252 = math.log %251 : vector<2x128xf32>
    %253 = arith.addf %243, %252 : vector<2x128xf32>
    %254 = arith.addf %253, %234 : vector<2x128xf32>
    %c12 = arith.constant 12 : index
    %c0_73 = arith.constant 0 : index
    %c0_74 = arith.constant 0 : index
    %255 = vector.load %arg0[%c12, %c0_73, %c0_74] : memref<16x2x128xf32, #tpu.memory_space<vmem>>, vector<1x2x128xf32>
    %256 = vector.shape_cast %255 : vector<1x2x128xf32> to vector<2x128xf32>
    %c1_i32_75 = arith.constant 1 : i32
    %257 = tpu.dynamic_rotate %254 by %c1_i32_75 dim 1 : vector<2x128xf32>, i32 -> vector<2x128xf32>
    %cst_76 = arith.constant -1.000000e+30 : f32
    %258 = vector.broadcast %cst_76 : f32 to vector<2x128xf32>
    %259 = arith.select %2, %257, %258 : vector<2x128xi1>, vector<2x128xf32>
    %c2_i32_77 = arith.constant 2 : i32
    %260 = tpu.dynamic_rotate %254 by %c2_i32_77 dim 1 : vector<2x128xf32>, i32 -> vector<2x128xf32>
    %cst_78 = arith.constant -1.000000e+30 : f32
    %261 = vector.broadcast %cst_78 : f32 to vector<2x128xf32>
    %262 = arith.select %4, %260, %261 : vector<2x128xi1>, vector<2x128xf32>
    %263 = arith.addf %262, %5 : vector<2x128xf32>
    %264 = arith.maximumf %254, %259 : vector<2x128xf32>
    %265 = arith.maximumf %264, %263 : vector<2x128xf32>
    %266 = arith.subf %254, %265 : vector<2x128xf32>
    %267 = math.exp %266 : vector<2x128xf32>
    %268 = arith.subf %259, %265 : vector<2x128xf32>
    %269 = math.exp %268 : vector<2x128xf32>
    %270 = arith.addf %267, %269 : vector<2x128xf32>
    %271 = arith.subf %263, %265 : vector<2x128xf32>
    %272 = math.exp %271 : vector<2x128xf32>
    %273 = arith.addf %270, %272 : vector<2x128xf32>
    %274 = math.log %273 : vector<2x128xf32>
    %275 = arith.addf %265, %274 : vector<2x128xf32>
    %276 = arith.addf %275, %256 : vector<2x128xf32>
    %c13 = arith.constant 13 : index
    %c0_79 = arith.constant 0 : index
    %c0_80 = arith.constant 0 : index
    %277 = vector.load %arg0[%c13, %c0_79, %c0_80] : memref<16x2x128xf32, #tpu.memory_space<vmem>>, vector<1x2x128xf32>
    %278 = vector.shape_cast %277 : vector<1x2x128xf32> to vector<2x128xf32>
    %c1_i32_81 = arith.constant 1 : i32
    %279 = tpu.dynamic_rotate %276 by %c1_i32_81 dim 1 : vector<2x128xf32>, i32 -> vector<2x128xf32>
    %cst_82 = arith.constant -1.000000e+30 : f32
    %280 = vector.broadcast %cst_82 : f32 to vector<2x128xf32>
    %281 = arith.select %2, %279, %280 : vector<2x128xi1>, vector<2x128xf32>
    %c2_i32_83 = arith.constant 2 : i32
    %282 = tpu.dynamic_rotate %276 by %c2_i32_83 dim 1 : vector<2x128xf32>, i32 -> vector<2x128xf32>
    %cst_84 = arith.constant -1.000000e+30 : f32
    %283 = vector.broadcast %cst_84 : f32 to vector<2x128xf32>
    %284 = arith.select %4, %282, %283 : vector<2x128xi1>, vector<2x128xf32>
    %285 = arith.addf %284, %5 : vector<2x128xf32>
    %286 = arith.maximumf %276, %281 : vector<2x128xf32>
    %287 = arith.maximumf %286, %285 : vector<2x128xf32>
    %288 = arith.subf %276, %287 : vector<2x128xf32>
    %289 = math.exp %288 : vector<2x128xf32>
    %290 = arith.subf %281, %287 : vector<2x128xf32>
    %291 = math.exp %290 : vector<2x128xf32>
    %292 = arith.addf %289, %291 : vector<2x128xf32>
    %293 = arith.subf %285, %287 : vector<2x128xf32>
    %294 = math.exp %293 : vector<2x128xf32>
    %295 = arith.addf %292, %294 : vector<2x128xf32>
    %296 = math.log %295 : vector<2x128xf32>
    %297 = arith.addf %287, %296 : vector<2x128xf32>
    %298 = arith.addf %297, %278 : vector<2x128xf32>
    %c14 = arith.constant 14 : index
    %c0_85 = arith.constant 0 : index
    %c0_86 = arith.constant 0 : index
    %299 = vector.load %arg0[%c14, %c0_85, %c0_86] : memref<16x2x128xf32, #tpu.memory_space<vmem>>, vector<1x2x128xf32>
    %300 = vector.shape_cast %299 : vector<1x2x128xf32> to vector<2x128xf32>
    %c1_i32_87 = arith.constant 1 : i32
    %301 = tpu.dynamic_rotate %298 by %c1_i32_87 dim 1 : vector<2x128xf32>, i32 -> vector<2x128xf32>
    %cst_88 = arith.constant -1.000000e+30 : f32
    %302 = vector.broadcast %cst_88 : f32 to vector<2x128xf32>
    %303 = arith.select %2, %301, %302 : vector<2x128xi1>, vector<2x128xf32>
    %c2_i32_89 = arith.constant 2 : i32
    %304 = tpu.dynamic_rotate %298 by %c2_i32_89 dim 1 : vector<2x128xf32>, i32 -> vector<2x128xf32>
    %cst_90 = arith.constant -1.000000e+30 : f32
    %305 = vector.broadcast %cst_90 : f32 to vector<2x128xf32>
    %306 = arith.select %4, %304, %305 : vector<2x128xi1>, vector<2x128xf32>
    %307 = arith.addf %306, %5 : vector<2x128xf32>
    %308 = arith.maximumf %298, %303 : vector<2x128xf32>
    %309 = arith.maximumf %308, %307 : vector<2x128xf32>
    %310 = arith.subf %298, %309 : vector<2x128xf32>
    %311 = math.exp %310 : vector<2x128xf32>
    %312 = arith.subf %303, %309 : vector<2x128xf32>
    %313 = math.exp %312 : vector<2x128xf32>
    %314 = arith.addf %311, %313 : vector<2x128xf32>
    %315 = arith.subf %307, %309 : vector<2x128xf32>
    %316 = math.exp %315 : vector<2x128xf32>
    %317 = arith.addf %314, %316 : vector<2x128xf32>
    %318 = math.log %317 : vector<2x128xf32>
    %319 = arith.addf %309, %318 : vector<2x128xf32>
    %320 = arith.addf %319, %300 : vector<2x128xf32>
    %c15 = arith.constant 15 : index
    %c0_91 = arith.constant 0 : index
    %c0_92 = arith.constant 0 : index
    %321 = vector.load %arg0[%c15, %c0_91, %c0_92] : memref<16x2x128xf32, #tpu.memory_space<vmem>>, vector<1x2x128xf32>
    %322 = vector.shape_cast %321 : vector<1x2x128xf32> to vector<2x128xf32>
    %c1_i32_93 = arith.constant 1 : i32
    %323 = tpu.dynamic_rotate %320 by %c1_i32_93 dim 1 : vector<2x128xf32>, i32 -> vector<2x128xf32>
    %cst_94 = arith.constant -1.000000e+30 : f32
    %324 = vector.broadcast %cst_94 : f32 to vector<2x128xf32>
    %325 = arith.select %2, %323, %324 : vector<2x128xi1>, vector<2x128xf32>
    %c2_i32_95 = arith.constant 2 : i32
    %326 = tpu.dynamic_rotate %320 by %c2_i32_95 dim 1 : vector<2x128xf32>, i32 -> vector<2x128xf32>
    %cst_96 = arith.constant -1.000000e+30 : f32
    %327 = vector.broadcast %cst_96 : f32 to vector<2x128xf32>
    %328 = arith.select %4, %326, %327 : vector<2x128xi1>, vector<2x128xf32>
    %329 = arith.addf %328, %5 : vector<2x128xf32>
    %330 = arith.maximumf %320, %325 : vector<2x128xf32>
    %331 = arith.maximumf %330, %329 : vector<2x128xf32>
    %332 = arith.subf %320, %331 : vector<2x128xf32>
    %333 = math.exp %332 : vector<2x128xf32>
    %334 = arith.subf %325, %331 : vector<2x128xf32>
    %335 = math.exp %334 : vector<2x128xf32>
    %336 = arith.addf %333, %335 : vector<2x128xf32>
    %337 = arith.subf %329, %331 : vector<2x128xf32>
    %338 = math.exp %337 : vector<2x128xf32>
    %339 = arith.addf %336, %338 : vector<2x128xf32>
    %340 = math.log %339 : vector<2x128xf32>
    %341 = arith.addf %331, %340 : vector<2x128xf32>
    %342 = arith.addf %341, %322 : vector<2x128xf32>
    %343 = arith.addf %342, %6 : vector<2x128xf32>
    %cst_97 = arith.constant dense<0xFF800000> : vector<2xf32>
    %344 = vector.multi_reduction <maximumf>, %343, %cst_97 [1] : vector<2x128xf32> to vector<2xf32>
    %345 = vector.shape_cast %344 : vector<2xf32> to vector<2x1xf32>
    %346 = vector.broadcast %345 : vector<2x1xf32> to vector<2x128xf32>
    %347 = arith.subf %343, %346 : vector<2x128xf32>
    %348 = math.exp %347 : vector<2x128xf32>
    %cst_98 = arith.constant dense<0.000000e+00> : vector<2xf32>
    %349 = vector.multi_reduction <add>, %348, %cst_98 [1] : vector<2x128xf32> to vector<2xf32>
    %350 = vector.shape_cast %349 : vector<2xf32> to vector<2x1xf32>
    %351 = math.log %350 : vector<2x1xf32>
    %352 = arith.addf %345, %351 : vector<2x1xf32>
    %cst_99 = arith.constant 0.000000e+00 : f32
    %353 = vector.broadcast %cst_99 : f32 to vector<2x1xf32>
    %354 = arith.subf %353, %352 : vector<2x1xf32>
    %c0_100 = arith.constant 0 : index
    %c0_101 = arith.constant 0 : index
    %355 = vector.load %arg3[%c0_100, %c0_101] : memref<2x1xf32, #tpu.memory_space<vmem>>, vector<2x1xf32>
    tpu.vector_store %arg3[%c0_100, %c0_101], %354 {strides = array<i32>} : memref<2x1xf32, #tpu.memory_space<vmem>>, vector<2x1xf32>,
    return
  }
}

</mosaic_0001>

<bundles_post_ra>
// kernel: tpu_custom_call.1
= control target key start
LH: loop header
LB: loop body
LE: loop exit
PB: predicated region body
PF: predicated region fallthrough
CT: control target
= control target key end

     0   :  { %8 = vsyncpa [#allocation3], 0  ;;  %s601_s12 = smov [#allocation2]   ;;  %s759_s0 = inlined_call_operand.hbm [shape: f32[16,2,128], index: 0, kind: input, shape index: {}]   ;;  %s760_s1 = inlined_call_operand.vmem [shape: f32[2,128], index: 1, kind: input, shape index: {}]   ;;  %s761_s2 = inlined_call_operand.vmem [shape: f32[2,128], index: 2, kind: input, shape index: {}]   ;;  %s762_s3 = inlined_call_operand.vmem [shape: f32[2,1], index: 3, kind: output, shape index: {}]  }
   0x1   :  { %s14_s13 = sshll.u32 %s601_s12, 4  ;;  %s577_s16 = scalar_lea.hbm %s759_s0, 512  ;;  %s15_s13 = int_to_ptr.vmem [resolvable:$true] %s14_s13 }
   0x2   :  { %p578_p0 = scmp.ne.s32.totalorder %s759_s0, %s577_s16  ;;  %p581_p1 = scmp.lt.u32.totalorder %s577_s16, %s759_s0 }
   0x4   :  { %p583_p2 = pnand %p581_p1, %p578_p0 }
   0x6   :  { %586 = shalt.err (!%p583_p2)
}
   0x7   :  { %s587_s21 = scalar_lea.vmem %s15_s13, 512  ;;  %p592_p4 = scmp.lt.s32.totalorder %s15_s13, %s15_s13 }
   0x8   :  { %p588_p3 = scmp.ne.s32.totalorder %s15_s13, %s587_s21  ;;  %p593_p5 = scmp.lt.s32.totalorder %s587_s21, %s587_s21 }
   0xa   :  { %p594_p6 = por %p593_p5, %p592_p4 }
   0xc   :  { %p595_p7 = pnand %p594_p6, %p588_p3 }
   0xe   :  { %598 = shalt.err (!%p595_p7)
}
   0xf   :  { %s602_s22 = smov 32   ;;  %s603_s23 = smov 2  }
  0x10   :  { %20 = dma.hbm_to_vmem [thread:$0]  %s759_s0, 512, %s15_s13, [#allocation3], %s602_s22, %s602_s22, %s603_s23  }
  0x11   :  { %599 = dma.done.wait [#allocation3], 512  }
  0x12   :  { %600 = vsyncadd [#allocation3], 4294966784  ;;  %v28_v0 = vlaneseq  ;;  %v35_v2 = vld [vmem:[#allocation2] sm:$0x3]  ;;  %s604_s26 = smov 1   ;;  %vm428_vm3 = vcmask 1041408  }
  0x13   :  { %v650_v6 = vld [vmem:[%s760_s1] sm:$0x3]  ;;  %v38_v25 = vld [vmem:[#allocation2 + $0x2] sm:$0x3]  ;;  %v64_v48 = vld [vmem:[#allocation2 + $0x4] sm:$0x3] }
  0x14   :  { %v638_v1 = vand.u32 127, %v28_v0  ;;  %vm442_vm4 = vcmask 1024  }
  0x16   :  { %vm34_vm0 = vcmp.lt.s32.totalorder %v638_v1, 2  ;;  %vm30_vm1 = vcmp.ge.s32.totalorder %v638_v1, 1  ;;  %vm31_vm2 = vcmp.ge.s32.totalorder %v638_v1, 2 }
  0x17   :  { %v36_v3 = vsel %vm34_vm0, %v35_v2, -1e+30 }
  0x18   :  { %39 = vrot.lane.b32.xlu0 %v36_v3, %s604_s26 }
  0x1c   :  { %42 = vrot.lane.b32.xlu0 %v36_v3, %s603_s23 }
  0x8a   :  { %v40_v4 = vpop.permute.xlu0 %39 }
  0x8b   :  { %v41_v5 = vsel %vm30_vm1, %v40_v4, -1e+30 }
  0x8c   :  { %v46_v9 = vmax.f32 %v36_v3, %v41_v5 }
  0x8e   :  { %v43_v7 = vpop.permute.xlu0 %42 }
  0x8f   :  { %v44_v8 = vsel %vm31_vm2, %v43_v7, -1e+30 }
  0x90   :  { %v45_v10 = vadd.f32 %v44_v8, %v650_v6 }
  0x92   :  { %v47_v11 = vmax.f32 %v46_v9, %v45_v10  ;;  %v90_v9 = vld [vmem:[#allocation2 + $0x6] sm:$0x3] }
  0x94   :  { %v48_v12 = vsub.f32 %v36_v3, %v47_v11  ;;  %v51_v13 = vsub.f32 %v41_v5, %v47_v11  ;;  %v55_v14 = vsub.f32 %v45_v10, %v47_v11 }
  0x96   :  { %v49_v15 = vmul.f32 1.442695, %v48_v12  ;;  %v52_v16 = vmul.f32 1.442695, %v51_v13  ;;  %v56_v17 = vmul.f32 1.442695, %v55_v14 }
  0x98   :  { %453 = vpow2.f32 %v49_v15 }
  0x99   :  { %455 = vpow2.f32 %v52_v16 }
  0x9a   :  { %457 = vpow2.f32 %v56_v17 }
  0xa2   :  { %v454_v18 = vpop.eup %453 }
  0xa3   :  { %v456_v19 = vpop.eup %455 }
  0xa4   :  { %v54_v20 = vadd.f32 %v456_v19, %v454_v18  ;;  %v458_v21 = vpop.eup %457 }
  0xa6   :  { %v58_v22 = vadd.f32 %v458_v21, %v54_v20 }
  0xa8   :  { %459 = vlog2.f32 %v58_v22 }
  0xb2   :  { %v460_v23 = vpop.eup %459 }
  0xb3   :  { %v60_v24 = vmul.f32 0.6931472, %v460_v23 }
  0xb5   :  { %v61_v26 = vadd.f32 %v60_v24, %v47_v11 }
  0xb7   :  { %v62_v27 = vadd.f32 %v61_v26, %v38_v25 }
  0xb9   :  { %65 = vrot.lane.b32.xlu1 %v62_v27, %s604_s26 }
  0xbd   :  { %68 = vrot.lane.b32.xlu1 %v62_v27, %s603_s23 }
 0x12b   :  { %v66_v28 = vpop.permute.xlu1 %65 }
 0x12c   :  { %v67_v29 = vsel %vm30_vm1, %v66_v28, -1e+30 }
 0x12d   :  { %v72_v32 = vmax.f32 %v62_v27, %v67_v29 }
 0x12f   :  { %v69_v30 = vpop.permute.xlu1 %68 }
 0x130   :  { %v70_v31 = vsel %vm31_vm2, %v69_v30, -1e+30 }
 0x131   :  { %v71_v33 = vadd.f32 %v70_v31, %v650_v6 }
 0x133   :  { %v73_v34 = vmax.f32 %v72_v32, %v71_v33  ;;  %v116_v32 = vld [vmem:[#allocation2 + $0x8] sm:$0x3] }
 0x135   :  { %v74_v35 = vsub.f32 %v62_v27, %v73_v34  ;;  %v77_v36 = vsub.f32 %v67_v29, %v73_v34  ;;  %v81_v37 = vsub.f32 %v71_v33, %v73_v34 }
 0x137   :  { %v75_v38 = vmul.f32 1.442695, %v74_v35  ;;  %v78_v39 = vmul.f32 1.442695, %v77_v36  ;;  %v82_v40 = vmul.f32 1.442695, %v81_v37 }
 0x139   :  { %461 = vpow2.f32 %v75_v38 }
 0x13a   :  { %463 = vpow2.f32 %v78_v39 }
 0x13b   :  { %465 = vpow2.f32 %v82_v40 }
 0x143   :  { %v462_v41 = vpop.eup %461 }
 0x144   :  { %v464_v42 = vpop.eup %463 }
 0x145   :  { %v80_v43 = vadd.f32 %v464_v42, %v462_v41  ;;  %v466_v44 = vpop.eup %465 }
 0x147   :  { %v84_v45 = vadd.f32 %v466_v44, %v80_v43 }
 0x149   :  { %467 = vlog2.f32 %v84_v45 }
 0x153   :  { %v468_v46 = vpop.eup %467 }
 0x154   :  { %v86_v47 = vmul.f32 0.6931472, %v468_v46 }
 0x156   :  { %v87_v49 = vadd.f32 %v86_v47, %v73_v34 }
 0x158   :  { %v88_v50 = vadd.f32 %v87_v49, %v64_v48 }
 0x15a   :  { %94 = vrot.lane.b32.xlu1 %v88_v50, %s603_s23  ;;  %91 = vrot.lane.b32.xlu0 %v88_v50, %s604_s26 }
 0x1cc   :  { %v95_v51 = vpop.permute.xlu1 %94  ;;  %v92_v52 = vpop.permute.xlu0 %91 }
 0x1cd   :  { %v96_v53 = vsel %vm31_vm2, %v95_v51, -1e+30  ;;  %v93_v54 = vsel %vm30_vm1, %v92_v52, -1e+30 }
 0x1ce   :  { %v97_v55 = vadd.f32 %v96_v53, %v650_v6  ;;  %v98_v56 = vmax.f32 %v88_v50, %v93_v54 }
 0x1d0   :  { %v99_v57 = vmax.f32 %v98_v56, %v97_v55 }
 0x1d2   :  { %v100_v58 = vsub.f32 %v88_v50, %v99_v57  ;;  %v103_v59 = vsub.f32 %v93_v54, %v99_v57  ;;  %v107_v60 = vsub.f32 %v97_v55, %v99_v57  ;;  %v142_v55 = vld [vmem:[#allocation2 + $0xa] sm:$0x3] }
 0x1d4   :  { %v101_v61 = vmul.f32 1.442695, %v100_v58  ;;  %v104_v62 = vmul.f32 1.442695, %v103_v59  ;;  %v108_v63 = vmul.f32 1.442695, %v107_v60 }
 0x1d6   :  { %469 = vpow2.f32 %v101_v61 }
 0x1d7   :  { %471 = vpow2.f32 %v104_v62 }
 0x1d8   :  { %473 = vpow2.f32 %v108_v63 }
 0x1e0   :  { %v470_v0 = vpop.eup %469 }
 0x1e1   :  { %v472_v2 = vpop.eup %471 }
 0x1e2   :  { %v106_v3 = vadd.f32 %v472_v2, %v470_v0  ;;  %v474_v4 = vpop.eup %473 }
 0x1e4   :  { %v110_v5 = vadd.f32 %v474_v4, %v106_v3 }
 0x1e6   :  { %475 = vlog2.f32 %v110_v5 }
 0x1f0   :  { %v476_v7 = vpop.eup %475 }
 0x1f1   :  { %v112_v8 = vmul.f32 0.6931472, %v476_v7 }
 0x1f3   :  { %v113_v10 = vadd.f32 %v112_v8, %v99_v57 }
 0x1f5   :  { %v114_v11 = vadd.f32 %v113_v10, %v90_v9 }
 0x1f7   :  { %120 = vrot.lane.b32.xlu1 %v114_v11, %s603_s23  ;;  %117 = vrot.lane.b32.xlu0 %v114_v11, %s604_s26 }
 0x269   :  { %v121_v12 = vpop.permute.xlu1 %120  ;;  %v118_v13 = vpop.permute.xlu0 %117 }
 0x26a   :  { %v122_v14 = vsel %vm31_vm2, %v121_v12, -1e+30  ;;  %v119_v15 = vsel %vm30_vm1, %v118_v13, -1e+30 }
 0x26b   :  { %v123_v16 = vadd.f32 %v122_v14, %v650_v6  ;;  %v124_v17 = vmax.f32 %v114_v11, %v119_v15 }
 0x26d   :  { %v125_v18 = vmax.f32 %v124_v17, %v123_v16 }
 0x26f   :  { %v126_v19 = vsub.f32 %v114_v11, %v125_v18  ;;  %v129_v20 = vsub.f32 %v119_v15, %v125_v18  ;;  %v133_v21 = vsub.f32 %v123_v16, %v125_v18  ;;  %v168_v16 = vld [vmem:[#allocation2 + $0xc] sm:$0x3] }
 0x271   :  { %v127_v22 = vmul.f32 1.442695, %v126_v19  ;;  %v130_v23 = vmul.f32 1.442695, %v129_v20  ;;  %v134_v24 = vmul.f32 1.442695, %v133_v21 }
 0x273   :  { %477 = vpow2.f32 %v127_v22 }
 0x274   :  { %479 = vpow2.f32 %v130_v23 }
 0x275   :  { %481 = vpow2.f32 %v134_v24 }
 0x27d   :  { %v478_v25 = vpop.eup %477 }
 0x27e   :  { %v480_v26 = vpop.eup %479 }
 0x27f   :  { %v132_v27 = vadd.f32 %v480_v26, %v478_v25  ;;  %v482_v28 = vpop.eup %481 }
 0x281   :  { %v136_v29 = vadd.f32 %v482_v28, %v132_v27 }
 0x283   :  { %483 = vlog2.f32 %v136_v29 }
 0x28d   :  { %v484_v30 = vpop.eup %483 }
 0x28e   :  { %v138_v31 = vmul.f32 0.6931472, %v484_v30 }
 0x290   :  { %v139_v33 = vadd.f32 %v138_v31, %v125_v18 }
 0x292   :  { %v140_v34 = vadd.f32 %v139_v33, %v116_v32 }
 0x294   :  { %146 = vrot.lane.b32.xlu1 %v140_v34, %s603_s23  ;;  %143 = vrot.lane.b32.xlu0 %v140_v34, %s604_s26 }
 0x306   :  { %v147_v35 = vpop.permute.xlu1 %146  ;;  %v144_v36 = vpop.permute.xlu0 %143 }
 0x307   :  { %v148_v37 = vsel %vm31_vm2, %v147_v35, -1e+30  ;;  %v145_v38 = vsel %vm30_vm1, %v144_v36, -1e+30 }
 0x308   :  { %v149_v39 = vadd.f32 %v148_v37, %v650_v6  ;;  %v150_v40 = vmax.f32 %v140_v34, %v145_v38 }
 0x30a   :  { %v151_v41 = vmax.f32 %v150_v40, %v149_v39 }
 0x30c   :  { %v152_v42 = vsub.f32 %v140_v34, %v151_v41  ;;  %v155_v43 = vsub.f32 %v145_v38, %v151_v41  ;;  %v159_v44 = vsub.f32 %v149_v39, %v151_v41  ;;  %v194_v39 = vld [vmem:[#allocation2 + $0xe] sm:$0x3] }
 0x30e   :  { %v153_v45 = vmul.f32 1.442695, %v152_v42  ;;  %v156_v46 = vmul.f32 1.442695, %v155_v43  ;;  %v160_v47 = vmul.f32 1.442695, %v159_v44 }
 0x310   :  { %485 = vpow2.f32 %v153_v45 }
 0x311   :  { %487 = vpow2.f32 %v156_v46 }
 0x312   :  { %489 = vpow2.f32 %v160_v47 }
 0x31a   :  { %v486_v48 = vpop.eup %485 }
 0x31b   :  { %v488_v49 = vpop.eup %487 }
 0x31c   :  { %v158_v50 = vadd.f32 %v488_v49, %v486_v48  ;;  %v490_v51 = vpop.eup %489 }
 0x31e   :  { %v162_v52 = vadd.f32 %v490_v51, %v158_v50 }
 0x320   :  { %491 = vlog2.f32 %v162_v52 }
 0x32a   :  { %v492_v53 = vpop.eup %491 }
 0x32b   :  { %v164_v54 = vmul.f32 0.6931472, %v492_v53 }
 0x32d   :  { %v165_v56 = vadd.f32 %v164_v54, %v151_v41 }
 0x32f   :  { %v166_v57 = vadd.f32 %v165_v56, %v142_v55 }
 0x331   :  { %172 = vrot.lane.b32.xlu1 %v166_v57, %s603_s23  ;;  %169 = vrot.lane.b32.xlu0 %v166_v57, %s604_s26 }
 0x3a3   :  { %v173_v58 = vpop.permute.xlu1 %172  ;;  %v170_v59 = vpop.permute.xlu0 %169 }
 0x3a4   :  { %v174_v60 = vsel %vm31_vm2, %v173_v58, -1e+30  ;;  %v171_v61 = vsel %vm30_vm1, %v170_v59, -1e+30 }
 0x3a5   :  { %v175_v62 = vadd.f32 %v174_v60, %v650_v6  ;;  %v176_v63 = vmax.f32 %v166_v57, %v171_v61 }
 0x3a7   :  { %v177_v0 = vmax.f32 %v176_v63, %v175_v62 }
 0x3a9   :  { %v178_v2 = vsub.f32 %v166_v57, %v177_v0  ;;  %v181_v3 = vsub.f32 %v171_v61, %v177_v0  ;;  %v185_v4 = vsub.f32 %v175_v62, %v177_v0  ;;  %v220_v62 = vld [vmem:[#allocation2 + $0x10] sm:$0x3] }
 0x3ab   :  { %v179_v5 = vmul.f32 1.442695, %v178_v2  ;;  %v182_v7 = vmul.f32 1.442695, %v181_v3  ;;  %v186_v8 = vmul.f32 1.442695, %v185_v4 }
 0x3ad   :  { %493 = vpow2.f32 %v179_v5 }
 0x3ae   :  { %495 = vpow2.f32 %v182_v7 }
 0x3af   :  { %497 = vpow2.f32 %v186_v8 }
 0x3b7   :  { %v494_v9 = vpop.eup %493 }
 0x3b8   :  { %v496_v10 = vpop.eup %495 }
 0x3b9   :  { %v184_v11 = vadd.f32 %v496_v10, %v494_v9  ;;  %v498_v12 = vpop.eup %497 }
 0x3bb   :  { %v188_v13 = vadd.f32 %v498_v12, %v184_v11 }
 0x3bd   :  { %499 = vlog2.f32 %v188_v13 }
 0x3c7   :  { %v500_v14 = vpop.eup %499 }
 0x3c8   :  { %v190_v15 = vmul.f32 0.6931472, %v500_v14 }
 0x3ca   :  { %v191_v17 = vadd.f32 %v190_v15, %v177_v0 }
 0x3cc   :  { %v192_v18 = vadd.f32 %v191_v17, %v168_v16 }
 0x3ce   :  { %198 = vrot.lane.b32.xlu1 %v192_v18, %s603_s23  ;;  %195 = vrot.lane.b32.xlu0 %v192_v18, %s604_s26 }
 0x440   :  { %v199_v19 = vpop.permute.xlu1 %198  ;;  %v196_v20 = vpop.permute.xlu0 %195 }
 0x441   :  { %v200_v21 = vsel %vm31_vm2, %v199_v19, -1e+30  ;;  %v197_v22 = vsel %vm30_vm1, %v196_v20, -1e+30 }
 0x442   :  { %v201_v23 = vadd.f32 %v200_v21, %v650_v6  ;;  %v202_v24 = vmax.f32 %v192_v18, %v197_v22 }
 0x444   :  { %v203_v25 = vmax.f32 %v202_v24, %v201_v23 }
 0x446   :  { %v204_v26 = vsub.f32 %v192_v18, %v203_v25  ;;  %v207_v27 = vsub.f32 %v197_v22, %v203_v25  ;;  %v211_v28 = vsub.f32 %v201_v23, %v203_v25  ;;  %v246_v23 = vld [vmem:[#allocation2 + $0x12] sm:$0x3] }
 0x448   :  { %v205_v29 = vmul.f32 1.442695, %v204_v26  ;;  %v208_v30 = vmul.f32 1.442695, %v207_v27  ;;  %v212_v31 = vmul.f32 1.442695, %v211_v28 }
 0x44a   :  { %501 = vpow2.f32 %v205_v29 }
 0x44b   :  { %503 = vpow2.f32 %v208_v30 }
 0x44c   :  { %505 = vpow2.f32 %v212_v31 }
 0x454   :  { %v502_v32 = vpop.eup %501 }
 0x455   :  { %v504_v33 = vpop.eup %503 }
 0x456   :  { %v210_v34 = vadd.f32 %v504_v33, %v502_v32  ;;  %v506_v35 = vpop.eup %505 }
 0x458   :  { %v214_v36 = vadd.f32 %v506_v35, %v210_v34 }
 0x45a   :  { %507 = vlog2.f32 %v214_v36 }
 0x464   :  { %v508_v37 = vpop.eup %507 }
 0x465   :  { %v216_v38 = vmul.f32 0.6931472, %v508_v37 }
 0x467   :  { %v217_v40 = vadd.f32 %v216_v38, %v203_v25 }
 0x469   :  { %v218_v41 = vadd.f32 %v217_v40, %v194_v39 }
 0x46b   :  { %224 = vrot.lane.b32.xlu1 %v218_v41, %s603_s23  ;;  %221 = vrot.lane.b32.xlu0 %v218_v41, %s604_s26 }
 0x4dd   :  { %v225_v42 = vpop.permute.xlu1 %224  ;;  %v222_v43 = vpop.permute.xlu0 %221 }
 0x4de   :  { %v226_v44 = vsel %vm31_vm2, %v225_v42, -1e+30  ;;  %v223_v45 = vsel %vm30_vm1, %v222_v43, -1e+30 }
 0x4df   :  { %v227_v46 = vadd.f32 %v226_v44, %v650_v6  ;;  %v228_v47 = vmax.f32 %v218_v41, %v223_v45 }
 0x4e1   :  { %v229_v48 = vmax.f32 %v228_v47, %v227_v46 }
 0x4e3   :  { %v230_v49 = vsub.f32 %v218_v41, %v229_v48  ;;  %v233_v50 = vsub.f32 %v223_v45, %v229_v48  ;;  %v237_v51 = vsub.f32 %v227_v46, %v229_v48  ;;  %v272_v46 = vld [vmem:[#allocation2 + $0x14] sm:$0x3] }
 0x4e5   :  { %v231_v52 = vmul.f32 1.442695, %v230_v49  ;;  %v234_v53 = vmul.f32 1.442695, %v233_v50  ;;  %v238_v54 = vmul.f32 1.442695, %v237_v51 }
 0x4e7   :  { %509 = vpow2.f32 %v231_v52 }
 0x4e8   :  { %511 = vpow2.f32 %v234_v53 }
 0x4e9   :  { %513 = vpow2.f32 %v238_v54 }
 0x4f1   :  { %v510_v55 = vpop.eup %509 }
 0x4f2   :  { %v512_v56 = vpop.eup %511 }
 0x4f3   :  { %v236_v57 = vadd.f32 %v512_v56, %v510_v55  ;;  %v514_v58 = vpop.eup %513 }
 0x4f5   :  { %v240_v59 = vadd.f32 %v514_v58, %v236_v57 }
 0x4f7   :  { %515 = vlog2.f32 %v240_v59 }
 0x501   :  { %v516_v60 = vpop.eup %515 }
 0x502   :  { %v242_v61 = vmul.f32 0.6931472, %v516_v60 }
 0x504   :  { %v243_v63 = vadd.f32 %v242_v61, %v229_v48 }
 0x506   :  { %v244_v0 = vadd.f32 %v243_v63, %v220_v62 }
 0x508   :  { %250 = vrot.lane.b32.xlu1 %v244_v0, %s603_s23  ;;  %247 = vrot.lane.b32.xlu0 %v244_v0, %s604_s26 }
 0x57a   :  { %v251_v2 = vpop.permute.xlu1 %250  ;;  %v248_v3 = vpop.permute.xlu0 %247 }
 0x57b   :  { %v252_v4 = vsel %vm31_vm2, %v251_v2, -1e+30  ;;  %v249_v5 = vsel %vm30_vm1, %v248_v3, -1e+30 }
 0x57c   :  { %v253_v7 = vadd.f32 %v252_v4, %v650_v6  ;;  %v254_v8 = vmax.f32 %v244_v0, %v249_v5 }
 0x57e   :  { %v255_v9 = vmax.f32 %v254_v8, %v253_v7 }
 0x580   :  { %v256_v10 = vsub.f32 %v244_v0, %v255_v9  ;;  %v259_v11 = vsub.f32 %v249_v5, %v255_v9  ;;  %v263_v12 = vsub.f32 %v253_v7, %v255_v9  ;;  %v298_v7 = vld [vmem:[#allocation2 + $0x16] sm:$0x3] }
 0x582   :  { %v257_v13 = vmul.f32 1.442695, %v256_v10  ;;  %v260_v14 = vmul.f32 1.442695, %v259_v11  ;;  %v264_v15 = vmul.f32 1.442695, %v263_v12 }
 0x584   :  { %517 = vpow2.f32 %v257_v13 }
 0x585   :  { %519 = vpow2.f32 %v260_v14 }
 0x586   :  { %521 = vpow2.f32 %v264_v15 }
 0x58e   :  { %v518_v16 = vpop.eup %517 }
 0x58f   :  { %v520_v17 = vpop.eup %519 }
 0x590   :  { %v262_v18 = vadd.f32 %v520_v17, %v518_v16  ;;  %v522_v19 = vpop.eup %521 }
 0x592   :  { %v266_v20 = vadd.f32 %v522_v19, %v262_v18 }
 0x594   :  { %523 = vlog2.f32 %v266_v20 }
 0x59e   :  { %v524_v21 = vpop.eup %523 }
 0x59f   :  { %v268_v22 = vmul.f32 0.6931472, %v524_v21 }
 0x5a1   :  { %v269_v24 = vadd.f32 %v268_v22, %v255_v9 }
 0x5a3   :  { %v270_v25 = vadd.f32 %v269_v24, %v246_v23 }
 0x5a5   :  { %276 = vrot.lane.b32.xlu1 %v270_v25, %s603_s23  ;;  %273 = vrot.lane.b32.xlu0 %v270_v25, %s604_s26 }
 0x617   :  { %v277_v26 = vpop.permute.xlu1 %276  ;;  %v274_v27 = vpop.permute.xlu0 %273 }
 0x618   :  { %v278_v28 = vsel %vm31_vm2, %v277_v26, -1e+30  ;;  %v275_v29 = vsel %vm30_vm1, %v274_v27, -1e+30 }
 0x619   :  { %v279_v30 = vadd.f32 %v278_v28, %v650_v6  ;;  %v280_v31 = vmax.f32 %v270_v25, %v275_v29 }
 0x61b   :  { %v281_v32 = vmax.f32 %v280_v31, %v279_v30 }
 0x61d   :  { %v282_v33 = vsub.f32 %v270_v25, %v281_v32  ;;  %v285_v34 = vsub.f32 %v275_v29, %v281_v32  ;;  %v289_v35 = vsub.f32 %v279_v30, %v281_v32  ;;  %v324_v30 = vld [vmem:[#allocation2 + $0x18] sm:$0x3] }
 0x61f   :  { %v283_v36 = vmul.f32 1.442695, %v282_v33  ;;  %v286_v37 = vmul.f32 1.442695, %v285_v34  ;;  %v290_v38 = vmul.f32 1.442695, %v289_v35 }
 0x621   :  { %525 = vpow2.f32 %v283_v36 }
 0x622   :  { %527 = vpow2.f32 %v286_v37 }
 0x623   :  { %529 = vpow2.f32 %v290_v38 }
 0x62b   :  { %v526_v39 = vpop.eup %525 }
 0x62c   :  { %v528_v40 = vpop.eup %527 }
 0x62d   :  { %v288_v41 = vadd.f32 %v528_v40, %v526_v39  ;;  %v530_v42 = vpop.eup %529 }
 0x62f   :  { %v292_v43 = vadd.f32 %v530_v42, %v288_v41 }
 0x631   :  { %531 = vlog2.f32 %v292_v43 }
 0x63b   :  { %v532_v44 = vpop.eup %531 }
 0x63c   :  { %v294_v45 = vmul.f32 0.6931472, %v532_v44 }
 0x63e   :  { %v295_v47 = vadd.f32 %v294_v45, %v281_v32 }
 0x640   :  { %v296_v48 = vadd.f32 %v295_v47, %v272_v46 }
 0x642   :  { %302 = vrot.lane.b32.xlu1 %v296_v48, %s603_s23  ;;  %299 = vrot.lane.b32.xlu0 %v296_v48, %s604_s26 }
 0x6b4   :  { %v303_v49 = vpop.permute.xlu1 %302  ;;  %v300_v50 = vpop.permute.xlu0 %299 }
 0x6b5   :  { %v304_v51 = vsel %vm31_vm2, %v303_v49, -1e+30  ;;  %v301_v52 = vsel %vm30_vm1, %v300_v50, -1e+30 }
 0x6b6   :  { %v305_v53 = vadd.f32 %v304_v51, %v650_v6  ;;  %v306_v54 = vmax.f32 %v296_v48, %v301_v52 }
 0x6b8   :  { %v307_v55 = vmax.f32 %v306_v54, %v305_v53 }
 0x6ba   :  { %v308_v56 = vsub.f32 %v296_v48, %v307_v55  ;;  %v311_v57 = vsub.f32 %v301_v52, %v307_v55  ;;  %v315_v58 = vsub.f32 %v305_v53, %v307_v55  ;;  %v350_v53 = vld [vmem:[#allocation2 + $0x1a] sm:$0x3] }
 0x6bc   :  { %v309_v59 = vmul.f32 1.442695, %v308_v56  ;;  %v312_v60 = vmul.f32 1.442695, %v311_v57  ;;  %v316_v61 = vmul.f32 1.442695, %v315_v58 }
 0x6be   :  { %533 = vpow2.f32 %v309_v59 }
 0x6bf   :  { %535 = vpow2.f32 %v312_v60 }
 0x6c0   :  { %537 = vpow2.f32 %v316_v61 }
 0x6c8   :  { %v534_v62 = vpop.eup %533 }
 0x6c9   :  { %v536_v63 = vpop.eup %535 }
 0x6ca   :  { %v314_v0 = vadd.f32 %v536_v63, %v534_v62  ;;  %v538_v2 = vpop.eup %537 }
 0x6cc   :  { %v318_v3 = vadd.f32 %v538_v2, %v314_v0 }
 0x6ce   :  { %539 = vlog2.f32 %v318_v3 }
 0x6d8   :  { %v540_v4 = vpop.eup %539 }
 0x6d9   :  { %v320_v5 = vmul.f32 0.6931472, %v540_v4 }
 0x6db   :  { %v321_v8 = vadd.f32 %v320_v5, %v307_v55 }
 0x6dd   :  { %v322_v9 = vadd.f32 %v321_v8, %v298_v7 }
 0x6df   :  { %328 = vrot.lane.b32.xlu1 %v322_v9, %s603_s23  ;;  %325 = vrot.lane.b32.xlu0 %v322_v9, %s604_s26 }
 0x751   :  { %v329_v10 = vpop.permute.xlu1 %328  ;;  %v326_v11 = vpop.permute.xlu0 %325 }
 0x752   :  { %v330_v12 = vsel %vm31_vm2, %v329_v10, -1e+30  ;;  %v327_v13 = vsel %vm30_vm1, %v326_v11, -1e+30 }
 0x753   :  { %v331_v14 = vadd.f32 %v330_v12, %v650_v6  ;;  %v332_v15 = vmax.f32 %v322_v9, %v327_v13 }
 0x755   :  { %v333_v16 = vmax.f32 %v332_v15, %v331_v14 }
 0x757   :  { %v334_v17 = vsub.f32 %v322_v9, %v333_v16  ;;  %v337_v18 = vsub.f32 %v327_v13, %v333_v16  ;;  %v341_v19 = vsub.f32 %v331_v14, %v333_v16  ;;  %v376_v14 = vld [vmem:[#allocation2 + $0x1c] sm:$0x3] }
 0x759   :  { %v335_v20 = vmul.f32 1.442695, %v334_v17  ;;  %v338_v21 = vmul.f32 1.442695, %v337_v18  ;;  %v342_v22 = vmul.f32 1.442695, %v341_v19 }
 0x75b   :  { %541 = vpow2.f32 %v335_v20 }
 0x75c   :  { %543 = vpow2.f32 %v338_v21 }
 0x75d   :  { %545 = vpow2.f32 %v342_v22 }
 0x765   :  { %v542_v23 = vpop.eup %541 }
 0x766   :  { %v544_v24 = vpop.eup %543 }
 0x767   :  { %v340_v25 = vadd.f32 %v544_v24, %v542_v23  ;;  %v546_v26 = vpop.eup %545 }
 0x769   :  { %v344_v27 = vadd.f32 %v546_v26, %v340_v25 }
 0x76b   :  { %547 = vlog2.f32 %v344_v27 }
 0x775   :  { %v548_v28 = vpop.eup %547 }
 0x776   :  { %v346_v29 = vmul.f32 0.6931472, %v548_v28 }
 0x778   :  { %v347_v31 = vadd.f32 %v346_v29, %v333_v16 }
 0x77a   :  { %v348_v32 = vadd.f32 %v347_v31, %v324_v30 }
 0x77c   :  { %354 = vrot.lane.b32.xlu1 %v348_v32, %s603_s23  ;;  %351 = vrot.lane.b32.xlu0 %v348_v32, %s604_s26 }
 0x7ee   :  { %v355_v33 = vpop.permute.xlu1 %354  ;;  %v352_v34 = vpop.permute.xlu0 %351 }
 0x7ef   :  { %v356_v35 = vsel %vm31_vm2, %v355_v33, -1e+30  ;;  %v353_v36 = vsel %vm30_vm1, %v352_v34, -1e+30 }
 0x7f0   :  { %v357_v37 = vadd.f32 %v356_v35, %v650_v6  ;;  %v358_v38 = vmax.f32 %v348_v32, %v353_v36 }
 0x7f2   :  { %v359_v39 = vmax.f32 %v358_v38, %v357_v37 }
 0x7f4   :  { %v360_v40 = vsub.f32 %v348_v32, %v359_v39  ;;  %v363_v41 = vsub.f32 %v353_v36, %v359_v39  ;;  %v367_v42 = vsub.f32 %v357_v37, %v359_v39  ;;  %v33_v37 = vld [vmem:[%s761_s2] sm:$0x3] }
 0x7f6   :  { %v361_v43 = vmul.f32 1.442695, %v360_v40  ;;  %v364_v44 = vmul.f32 1.442695, %v363_v41  ;;  %v368_v45 = vmul.f32 1.442695, %v367_v42 }
 0x7f8   :  { %549 = vpow2.f32 %v361_v43 }
 0x7f9   :  { %551 = vpow2.f32 %v364_v44 }
 0x7fa   :  { %553 = vpow2.f32 %v368_v45 }
 0x802   :  { %v550_v46 = vpop.eup %549 }
 0x803   :  { %v552_v47 = vpop.eup %551 }
 0x804   :  { %v366_v48 = vadd.f32 %v552_v47, %v550_v46  ;;  %v554_v49 = vpop.eup %553 }
 0x806   :  { %v370_v50 = vadd.f32 %v554_v49, %v366_v48 }
 0x808   :  { %555 = vlog2.f32 %v370_v50 }
 0x812   :  { %v556_v51 = vpop.eup %555 }
 0x813   :  { %v372_v52 = vmul.f32 0.6931472, %v556_v51 }
 0x815   :  { %v373_v54 = vadd.f32 %v372_v52, %v359_v39 }
 0x817   :  { %v374_v55 = vadd.f32 %v373_v54, %v350_v53 }
 0x819   :  { %380 = vrot.lane.b32.xlu1 %v374_v55, %s603_s23  ;;  %377 = vrot.lane.b32.xlu0 %v374_v55, %s604_s26 }
 0x88b   :  { %v381_v56 = vpop.permute.xlu1 %380  ;;  %v378_v57 = vpop.permute.xlu0 %377 }
 0x88c   :  { %v382_v58 = vsel %vm31_vm2, %v381_v56, -1e+30  ;;  %v379_v59 = vsel %vm30_vm1, %v378_v57, -1e+30 }
 0x88d   :  { %v383_v60 = vadd.f32 %v382_v58, %v650_v6  ;;  %v384_v61 = vmax.f32 %v374_v55, %v379_v59 }
 0x88f   :  { %v385_v62 = vmax.f32 %v384_v61, %v383_v60 }
 0x891   :  { %v386_v63 = vsub.f32 %v374_v55, %v385_v62  ;;  %v389_v0 = vsub.f32 %v379_v59, %v385_v62  ;;  %v393_v2 = vsub.f32 %v383_v60, %v385_v62 }
 0x893   :  { %v387_v3 = vmul.f32 1.442695, %v386_v63  ;;  %v390_v4 = vmul.f32 1.442695, %v389_v0  ;;  %v394_v5 = vmul.f32 1.442695, %v393_v2 }
 0x895   :  { %557 = vpow2.f32 %v387_v3 }
 0x896   :  { %559 = vpow2.f32 %v390_v4 }
 0x897   :  { %561 = vpow2.f32 %v394_v5 }
 0x89f   :  { %v558_v7 = vpop.eup %557 }
 0x8a0   :  { %v560_v8 = vpop.eup %559 }
 0x8a1   :  { %v392_v9 = vadd.f32 %v560_v8, %v558_v7  ;;  %v562_v10 = vpop.eup %561 }
 0x8a3   :  { %v396_v11 = vadd.f32 %v562_v10, %v392_v9 }
 0x8a5   :  { %563 = vlog2.f32 %v396_v11 }
 0x8af   :  { %v564_v12 = vpop.eup %563 }
 0x8b0   :  { %v398_v13 = vmul.f32 0.6931472, %v564_v12 }
 0x8b2   :  { %v399_v15 = vadd.f32 %v398_v13, %v385_v62 }
 0x8b4   :  { %v400_v16 = vadd.f32 %v399_v15, %v376_v14 }
 0x8b6   :  { %406 = vrot.lane.b32.xlu1 %v400_v16, %s603_s23  ;;  %403 = vrot.lane.b32.xlu0 %v400_v16, %s604_s26 }
 0x928   :  { %v407_v17 = vpop.permute.xlu1 %406  ;;  %v404_v18 = vpop.permute.xlu0 %403 }
 0x929   :  { %v408_v19 = vsel %vm31_vm2, %v407_v17, -1e+30  ;;  %v405_v20 = vsel %vm30_vm1, %v404_v18, -1e+30 }
 0x92a   :  { %v409_v21 = vadd.f32 %v408_v19, %v650_v6  ;;  %v410_v22 = vmax.f32 %v400_v16, %v405_v20  ;;  %v402_v6 = vld [vmem:[#allocation2 + $0x1e] sm:$0x3] }
 0x92c   :  { %v411_v23 = vmax.f32 %v410_v22, %v409_v21 }
 0x92e   :  { %v412_v24 = vsub.f32 %v400_v16, %v411_v23  ;;  %v415_v25 = vsub.f32 %v405_v20, %v411_v23  ;;  %v419_v26 = vsub.f32 %v409_v21, %v411_v23 }
 0x930   :  { %v413_v27 = vmul.f32 1.442695, %v412_v24  ;;  %v416_v28 = vmul.f32 1.442695, %v415_v25  ;;  %v420_v29 = vmul.f32 1.442695, %v419_v26 }
 0x932   :  { %565 = vpow2.f32 %v413_v27 }
 0x933   :  { %567 = vpow2.f32 %v416_v28 }
 0x934   :  { %569 = vpow2.f32 %v420_v29 }
 0x93c   :  { %v566_v30 = vpop.eup %565 }
 0x93d   :  { %v568_v31 = vpop.eup %567 }
 0x93e   :  { %v418_v32 = vadd.f32 %v568_v31, %v566_v30  ;;  %v570_v33 = vpop.eup %569 }
 0x940   :  { %v422_v34 = vadd.f32 %v570_v33, %v418_v32 }
 0x942   :  { %571 = vlog2.f32 %v422_v34 }
 0x94c   :  { %v572_v1 = vpop.eup %571 }
 0x94d   :  { %v424_v35 = vmul.f32 0.6931472, %v572_v1 }
 0x94f   :  { %v425_v36 = vadd.f32 %v424_v35, %v411_v23 }
 0x951   :  { %v426_v38 = vadd.f32 %v425_v36, %v402_v6 }
 0x953   :  { %v427_v39 = vadd.f32 %v426_v38, %v33_v37 }
 0x955   :  { %v429_v40 = vsel %vm428_vm3, %v427_v39, -inf }
 0x956   :  { %430 = vmax.xlane.f32.xlu0 %v429_v40 }
 0x9e3   :  { %v431_v41 = vpop.xlane.xlu0 %430 }
 0x9e4   :  { %v432_v42 = vsub.f32 %v427_v39, %v431_v41 }
 0x9e6   :  { %v433_v43 = vmul.f32 1.442695, %v432_v42 }
 0x9e8   :  { %573 = vpow2.f32 %v433_v43 }
 0x9f2   :  { %v574_v44 = vpop.eup %573 }
 0x9f3   :  { %v435_v45 = vsel %vm428_vm3, %v574_v44, 0.0 }
 0x9f4   :  { %436 = vadd.xlane.f32.xlu1 %v435_v45 }
 0xa81   :  { %v437_v46 = vpop.xlane.xlu1 %436 }
 0xa82   :  { %575 = vlog2.f32 %v437_v46 }
 0xa8c   :  { %v576_v47 = vpop.eup %575 }
 0xa8d   :  { %v439_v48 = vmul.f32 0.6931472, %v576_v47 }
 0xa8f   :  { %v440_v49 = vadd.f32 %v439_v48, %v431_v41 }
 0xa91   :  { %v441_v50 = vsub.f32 0.0, %v440_v49 }
 0xa93   :  { %443 = vst.msk [vmem:[%s762_s3] sm:$0x3] %vm442_vm4, %v441_v50 }
 0xa94   :  { %448 = vsyncpa [#allocation3], 1 }

</bundles_post_ra>
